<compile_context>
chip_gen: v6e
topology: v6e:2x2x1
jax: 0.10.0
libtpu: 0.0.40
codegen_flags: <defaults>
</compile_context>

<pallas_src>
import functools

import jax
import jax.numpy as jnp
from jax.experimental import pallas as pl
from jax.experimental.pallas import tpu as pltpu

EPS = 1e-5


def _round_up(v, m):
    return (v + m - 1) // m * m


# ----------------------------- Pallas kernels ------------------------------ #
def _stats_kernel(*refs, has_identity):
    """Pass 1: accumulate per-channel sum / sum-of-squares for every BN branch.

    Grid = (cout_tiles, m_tiles); the m axis (last, "arbitrary") revisits the same
    [8, TN] output block, which therefore acts as a resident accumulator.
    Stats rows: [sum(y3), sum(y3^2), sum(y1), sum(y1^2), sum(x), sum(x^2), 0, 0].
    Zero-padded M rows / channels contribute exactly zero, so dividing by the true
    M in the wrapper yields the correct batch statistics.
    """
    if has_identity:
        p_ref, ck_ref, w3_ref, w1_ref, cid_ref, stats_ref = refs
    else:
        p_ref, ck_ref, w3_ref, w1_ref, stats_ref = refs
        cid_ref = None

    @pl.when(pl.program_id(1) == 0)
    def _init():
        stats_ref[...] = jnp.zeros_like(stats_ref)

    # bf16 operands, f32 accumulation on the MXU.
    y3 = jnp.dot(p_ref[...], w3_ref[...], preferred_element_type=jnp.float32)
    y1 = jnp.dot(ck_ref[...], w1_ref[...], preferred_element_type=jnp.float32)
    tn = y3.shape[1]

    def csum(v):  # per-tile partial column sum (accumulated across the M grid axis)
        return jnp.sum(v, axis=0, keepdims=True)

    rows = [csum(y3), csum(y3 * y3), csum(y1), csum(y1 * y1)]
    if has_identity:
        xi = cid_ref[...].astype(jnp.float32)
        rows += [csum(xi), csum(xi * xi)]
    else:
        rows += [jnp.zeros((1, tn), jnp.float32), jnp.zeros((1, tn), jnp.float32)]
    rows += [jnp.zeros((1, tn), jnp.float32), jnp.zeros((1, tn), jnp.float32)]
    stats_ref[...] += jnp.concatenate(rows, axis=0)


def _apply_kernel(p_ref, ck_ref, w3e_ref, w1e_ref, coef_ref, o_ref):
    """Pass 2: fused (conv3x3 + conv1x1 + identity) with folded BN + ReLU."""
    y = jnp.dot(p_ref[...], w3e_ref[...], preferred_element_type=jnp.float32)
    y = y + jnp.dot(ck_ref[...], w1e_ref[...], preferred_element_type=jnp.float32)
    y = y + coef_ref[0:1, :]                       # single folded bias row
    o_ref[...] = jnp.maximum(y, 0.0).astype(o_ref.dtype)


# ------------------------------ JAX glue ----------------------------------- #
def _im2col_3x3(x, stride):
    """x: [N,H,W,C] -> (patches [M, 9C] with taps ordered (ky,kx,c), center [M, C])."""
    n, h, w, c = x.shape
    xp = jnp.pad(x, ((0, 0), (1, 1), (1, 1), (0, 0)))
    ho = (h + 2 - 3) // stride + 1
    wo = (w + 2 - 3) // stride + 1
    taps = []
    for ky in range(3):
        for kx in range(3):
            taps.append(xp[:, ky:ky + (ho - 1) * stride + 1:stride,
                           kx:kx + (wo - 1) * stride + 1:stride, :])
    patches = jnp.stack(taps, axis=3).reshape(n * ho * wo, 9 * c)
    center = taps[4].reshape(n * ho * wo, c)       # the (ky=1,kx=1) tap == input pixel
    return patches, center, (n, ho, wo)


def repvgg_block_apply(x, params, downsample, *, tm_max=512, tn=128):
    """One RepVGGBlockTrain.  x: [N,H,W,Cin] f32 -> [N,Ho,Wo,Cout] f32."""
    stride = 2 if downsample else 1
    has_identity = not downsample
    cin = x.shape[-1]
    cout = params["w3"].shape[-1]

    patches, center, (n, ho, wo) = _im2col_3x3(x, stride)
    m = n * ho * wo
    k = patches.shape[1]                           # 9 * cin

    tm = min(tm_max, _round_up(m, 8))
    m_pad = _round_up(m, tm)
    k_pad = _round_up(k, 8)
    cin_pad = _round_up(cin, 128)
    cout_pad = _round_up(cout, tn)

    # bf16 MXU operands; zero padding contributes nothing to matmuls or statistics.
    patches_b = jnp.pad(patches, ((0, m_pad - m), (0, k_pad - k))).astype(jnp.bfloat16)
    center_b = jnp.pad(center, ((0, m_pad - m), (0, cin_pad - cin))).astype(jnp.bfloat16)

    w3 = jnp.pad(params["w3"], ((0, k_pad - k), (0, cout_pad - cout)))       # f32
    w1 = jnp.pad(params["w1"], ((0, cin_pad - cin), (0, cout_pad - cout)))   # f32
    pad_c = (0, cout_pad - cout)
    g3 = jnp.pad(params["g3"], pad_c); b3 = jnp.pad(params["b3"], pad_c)
    g1 = jnp.pad(params["g1"], pad_c); b1 = jnp.pad(params["b1"], pad_c)
    g0 = jnp.pad(params["g0"], pad_c); b0 = jnp.pad(params["b0"], pad_c)

    n_ct = cout_pad // tn
    n_mt = m_pad // tm
    grid = (n_ct, n_mt)
    vmem_limit = 48 * 1024 * 1024

    # ---------------- pass 1: branch statistics (tiled reduction) ---------------- #
    stats_in_specs = [
        pl.BlockSpec((tm, k_pad), lambda j, i: (i, 0)),
        pl.BlockSpec((tm, cin_pad), lambda j, i: (i, 0)),
        pl.BlockSpec((k_pad, tn), lambda j, i: (0, j)),
        pl.BlockSpec((cin_pad, tn), lambda j, i: (0, j)),
    ]
    stats_args = [patches_b, center_b,
                  w3.astype(jnp.bfloat16), w1.astype(jnp.bfloat16)]
    if has_identity:
        # identity branch stats need the centre tap lane-tiled along Cout (cin == cout)
        stats_in_specs.append(pl.BlockSpec((tm, tn), lambda j, i: (i, j)))
        stats_args.append(center_b)

    stats = pl.pallas_call(
        functools.partial(_stats_kernel, has_identity=has_identity),
        out_shape=jax.ShapeDtypeStruct((8, cout_pad), jnp.float32),
        grid=grid,
        in_specs=stats_in_specs,
        out_specs=pl.BlockSpec((8, tn), lambda j, i: (0, j)),
        compiler_params=pltpu.CompilerParams(
            dimension_semantics=("parallel", "arbitrary"),
            vmem_limit_bytes=vmem_limit),
    )(*stats_args)

    # --------- fold the three BatchNorms into the conv weights + one bias -------- #
    inv_m = 1.0 / float(m)

    def fold(srow, qrow, g, b):
        mu = stats[srow] * inv_m
        var = jnp.maximum(stats[qrow] * inv_m - mu * mu, 0.0)   # biased variance
        sc = g * jax.lax.rsqrt(var + EPS)
        return sc, b - sc * mu

    sc3, bi3 = fold(0, 1, g3, b3)
    sc1, bi1 = fold(2, 3, g1, b1)
    bias = bi3 + bi1
    w3_eff = (w3 * sc3[None, :]).astype(jnp.bfloat16)
    w1_eff = w1 * sc1[None, :]
    if has_identity:
        sc0, bi0 = fold(4, 5, g0, b0)
        bias = bias + bi0
        w1_eff = w1_eff + jnp.eye(cin_pad, cout_pad, dtype=jnp.float32) * sc0[None, :]
    w1_eff = w1_eff.astype(jnp.bfloat16)
    coef = jnp.zeros((8, cout_pad), jnp.float32).at[0, :].set(bias)

    # -------------- pass 2: fused conv + folded BN + ReLU (lane dense) ----------- #
    out = pl.pallas_call(
        _apply_kernel,
        out_shape=jax.ShapeDtypeStruct((m_pad, cout_pad), jnp.float32),
        grid=grid,
        in_specs=[
            pl.BlockSpec((tm, k_pad), lambda j, i: (i, 0)),
            pl.BlockSpec((tm, cin_pad), lambda j, i: (i, 0)),
            pl.BlockSpec((k_pad, tn), lambda j, i: (0, j)),
            pl.BlockSpec((cin_pad, tn), lambda j, i: (0, j)),
            pl.BlockSpec((8, tn), lambda j, i: (0, j)),
        ],
        out_specs=pl.BlockSpec((tm, tn), lambda j, i: (i, j)),
        compiler_params=pltpu.CompilerParams(
            dimension_semantics=("parallel", "parallel"),
            vmem_limit_bytes=vmem_limit),
    )(patches_b, center_b, w3_eff, w1_eff, coef)

    return out[:m, :cout].reshape(n, ho, wo, cout)


def init_block_params(key, cin, cout):
    ks = jax.random.split(key, 8)
    # PyTorch conv layouts (OIHW), converted to matmul matrices.
    w3_t = jax.random.normal(ks[0], (cout, cin, 3, 3), jnp.float32) / jnp.sqrt(9.0 * cin)
    w1_t = jax.random.normal(ks[1], (cout, cin, 1, 1), jnp.float32) / jnp.sqrt(1.0 * cin)
    w3 = jnp.transpose(w3_t, (2, 3, 1, 0)).reshape(9 * cin, cout)   # [(ky,kx,cin), cout]
    w1 = jnp.transpose(w1_t[:, :, 0, 0], (1, 0))                    # [cin, cout]
    return dict(
        w3=w3, w1=w1, w3_t=w3_t, w1_t=w1_t,
        g3=1.0 + 0.1 * jax.random.normal(ks[2], (cout,), jnp.float32),
        b3=0.1 * jax.random.normal(ks[3], (cout,), jnp.float32),
        g1=1.0 + 0.1 * jax.random.normal(ks[4], (cout,), jnp.float32),
        b1=0.1 * jax.random.normal(ks[5], (cout,), jnp.float32),
        g0=1.0 + 0.1 * jax.random.normal(ks[6], (cout,), jnp.float32),
        b0=0.1 * jax.random.normal(ks[7], (cout,), jnp.float32),
    )


def build_model(key, block_num, channel_num):
    """Mirror RepVGGBaseMTrain.__init__ / make_layer: first block of every stage
    downsamples (stride 2, cin -> cout); the rest keep channels + identity BN."""
    assert len(channel_num) - len(block_num) == 1
    blocks = []
    for i in range(len(block_num)):
        for j in range(block_num[i]):
            downsample = (j == 0)
            cin = channel_num[i] if j == 0 else channel_num[i + 1]
            cout = channel_num[i + 1]
            key, sub = jax.random.split(key)
            blocks.append((init_block_params(sub, cin, cout), downsample))
    return blocks


def repvgg_forward(x_nchw, blocks):
    x = jnp.transpose(x_nchw, (0, 2, 3, 1))        # NCHW -> NHWC
    for params, downsample in blocks:
        x = repvgg_block_apply(x, params, downsample)
    return jnp.transpose(x, (0, 3, 1, 2))          # back to NCHW


# ----------------- references (kernel-correctness + f32 semantics) ---------------- #
def _block_matched(x, params, downsample):
    """Pure-JAX replica of the exact kernel algorithm (bf16 matmuls, folded BN)."""
    stride = 2 if downsample else 1
    has_identity = not downsample
    patches, center, (n, ho, wo) = _im2col_3x3(x, stride)
    cout = params["w3"].shape[-1]
    pb = patches.astype(jnp.bfloat16)
    cb = center.astype(jnp.bfloat16)
    y3 = jnp.dot(pb, params["w3"].astype(jnp.bfloat16), preferred_element_type=jnp.float32)
    y1 = jnp.dot(cb, params["w1"].astype(jnp.bfloat16), preferred_element_type=jnp.float32)

    def fold(y, g, b):
        mu = jnp.mean(y, axis=0)
        var = jnp.maximum(jnp.mean(y * y, axis=0) - mu * mu, 0.0)
        sc = g * jax.lax.rsqrt(var + EPS)
        return sc, b - sc * mu

    sc3, bi3 = fold(y3, params["g3"], params["b3"])
    sc1, bi1 = fold(y1, params["g1"], params["b1"])
    bias = bi3 + bi1
    w3e = (params["w3"] * sc3[None, :]).astype(jnp.bfloat16)
    w1e = params["w1"] * sc1[None, :]
    if has_identity:
        xi = cb.astype(jnp.float32)
        sc0, bi0 = fold(xi, params["g0"], params["b0"])
        bias = bias + bi0
        w1e = w1e + jnp.eye(center.shape[1], cout, dtype=jnp.float32) * sc0[None, :]
    w1e = w1e.astype(jnp.bfloat16)
    y = (jnp.dot(pb, w3e, preferred_element_type=jnp.float32)
         + jnp.dot(cb, w1e, preferred_element_type=jnp.float32) + bias[None, :])
    return jnp.maximum(y, 0.0).reshape(n, ho, wo, cout)


def forward_matched(x_nchw, blocks):
    x = jnp.transpose(x_nchw, (0, 2, 3, 1))
    for params, downsample in blocks:
        x = _block_matched(x, params, downsample)
    return jnp.transpose(x, (0, 3, 1, 2))


def _conv_nhwc(x, w_oihw, stride, pad):
    w = jnp.transpose(w_oihw, (2, 3, 1, 0))        # OIHW -> HWIO
    return jax.lax.conv_general_dilated(
        x, w, (stride, stride), [(pad, pad), (pad, pad)],
        dimension_numbers=("NHWC", "HWIO", "NHWC"))


def _bn_ref(y, g, b):
    mu = jnp.mean(y, axis=(0, 1, 2), keepdims=True)
    var = jnp.mean((y - mu) ** 2, axis=(0, 1, 2), keepdims=True)
    return (y - mu) * jax.lax.rsqrt(var + EPS) * g.reshape(1, 1, 1, -1) + b.reshape(1, 1, 1, -1)


def forward_f32(x_nchw, blocks):
    x = jnp.transpose(x_nchw, (0, 2, 3, 1))
    for params, downsample in blocks:
        stride = 2 if downsample else 1
        y = _bn_ref(_conv_nhwc(x, params["w3_t"], stride, 1), params["g3"], params["b3"]) \
          + _bn_ref(_conv_nhwc(x, params["w1_t"], stride, 0), params["g1"], params["b1"])
        if not downsample:
            y = y + _bn_ref(x, params["g0"], params["b0"])
        x = jnp.maximum(y, 0.0)
    return jnp.transpose(x, (0, 3, 1, 2))


# ------------------------------------- main --------------------------------------- #
if __name__ == "__main__":
    key = jax.random.PRNGKey(0)
    kx, kp = jax.random.split(key)

    block_num = [2, 2]          # two stages, two blocks each
    channel_num = [4, 8, 16]    # len(channel_num) - len(block_num) == 1

    x = jax.random.normal(kx, (2, 4, 16, 16), jnp.float32)   # NCHW, like PyTorch
    blocks = build_model(kp, block_num, channel_num)

    out = jax.block_until_ready(repvgg_forward(x, blocks))
    assert out.shape == (2, 16, 4, 4), out.shape

    # Tight check: pure-JAX replica of the exact same (bf16-matmul, folded-BN) math
    # verifies the kernels (tiling, accumulation, folding) are correct.
    ref_m = forward_matched(x, blocks)
    err_m = float(jnp.max(jnp.abs(out - ref_m)))
    assert err_m < 2e-2, f"bf16-matched reference mismatch: {err_m}"

    # Loose sanity check vs full-f32 PyTorch-semantics reference (bf16 matmuls plus
    # BN renormalization compound small relative errors across blocks).
    ref_f = forward_f32(x, blocks)
    rel_f = float(jnp.max(jnp.abs(out - ref_f))) / (float(jnp.max(jnp.abs(ref_f))) + 1e-6)
    assert rel_f < 1.5e-1, f"f32 reference relative error too large: {rel_f}"

    print("KERNEL_OK")
</pallas_src>

<mosaic_0001>
module attributes {stable_mosaic.version = 11 : i64} {
  func.func @_stats_kernel(%arg0: i32, %arg1: i32, %arg2: memref<128x40xbf16, #tpu.memory_space<vmem>>, %arg3: memref<128x128xbf16, #tpu.memory_space<vmem>>, %arg4: memref<40x128xbf16, #tpu.memory_space<vmem>>, %arg5: memref<128x128xbf16, #tpu.memory_space<vmem>>, %arg6: memref<8x128xf32, #tpu.memory_space<vmem>>) attributes {dimension_semantics = [#tpu.dimension_semantics<parallel>, #tpu.dimension_semantics<arbitrary>], iteration_bounds = array<i64: 1, 1>, scalar_prefetch = 0 : i64, scratch_operands = 0 : i64, tpu.core_type = #tpu.core_type<tc>, window_params = [{transform_indices = @transform_0, window_bounds = array<i64: 128, 40>}, {transform_indices = @transform_1, window_bounds = array<i64: 128, 128>}, {transform_indices = @transform_2, window_bounds = array<i64: 40, 128>}, {transform_indices = @transform_3, window_bounds = array<i64: 128, 128>}, {transform_indices = @transform_4, window_bounds = array<i64: 8, 128>}]} {
    %c0_i32 = arith.constant 0 : i32
    %0 = arith.cmpi eq, %arg1, %c0_i32 : i32
    %1 = arith.extui %0 : i1 to i32
    %c0_i32_0 = arith.constant 0 : i32
    %2 = arith.cmpi ne, %1, %c0_i32_0 : i32
    scf.if %2 {
      %cst_21 = arith.constant 0.000000e+00 : f32
      %27 = vector.broadcast %cst_21 : f32 to vector<8x128xf32>
      %c0_22 = arith.constant 0 : index
      %c0_23 = arith.constant 0 : index
      %28 = vector.load %arg6[%c0_22, %c0_23] : memref<8x128xf32, #tpu.memory_space<vmem>>, vector<8x128xf32>
      tpu.vector_store %arg6[%c0_22, %c0_23], %27 {strides = array<i32>} : memref<8x128xf32, #tpu.memory_space<vmem>>, vector<8x128xf32>,
    } else {
    }
    %c0 = arith.constant 0 : index
    %c0_1 = arith.constant 0 : index
    %3 = vector.load %arg2[%c0, %c0_1] : memref<128x40xbf16, #tpu.memory_space<vmem>>, vector<128x40xbf16>
    %c0_2 = arith.constant 0 : index
    %c0_3 = arith.constant 0 : index
    %4 = vector.load %arg4[%c0_2, %c0_3] : memref<40x128xbf16, #tpu.memory_space<vmem>>, vector<40x128xbf16>
    %cst = arith.constant dense<0.000000e+00> : vector<128x128xf32>
    %5 = tpu.matmul %3, %4, %cst {dimension_numbers = #tpu.dot_dimension_numbers<[1], [0], [0], [1], [0, 0, 1, 1], [], []>} : vector<128x40xbf16>, vector<40x128xbf16>, vector<128x128xf32> -> vector<128x128xf32>
    %c0_4 = arith.constant 0 : index
    %c0_5 = arith.constant 0 : index
    %6 = vector.load %arg3[%c0_4, %c0_5] : memref<128x128xbf16, #tpu.memory_space<vmem>>, vector<128x128xbf16>
    %c0_6 = arith.constant 0 : index
    %c0_7 = arith.constant 0 : index
    %7 = vector.load %arg5[%c0_6, %c0_7] : memref<128x128xbf16, #tpu.memory_space<vmem>>, vector<128x128xbf16>
    %cst_8 = arith.constant dense<0.000000e+00> : vector<128x128xf32>
    %8 = tpu.matmul %6, %7, %cst_8 {dimension_numbers = #tpu.dot_dimension_numbers<[1], [0], [0], [1], [0, 0, 1, 1], [], []>} : vector<128x128xbf16>, vector<128x128xbf16>, vector<128x128xf32> -> vector<128x128xf32>
    %cst_9 = arith.constant dense<0.000000e+00> : vector<128xf32>
    %9 = vector.multi_reduction <add>, %5, %cst_9 [0] : vector<128x128xf32> to vector<128xf32>
    %10 = vector.shape_cast %9 : vector<128xf32> to vector<1x128xf32>
    %11 = arith.mulf %5, %5 : vector<128x128xf32>
    %cst_10 = arith.constant dense<0.000000e+00> : vector<128xf32>
    %12 = vector.multi_reduction <add>, %11, %cst_10 [0] : vector<128x128xf32> to vector<128xf32>
    %13 = vector.shape_cast %12 : vector<128xf32> to vector<1x128xf32>
    %cst_11 = arith.constant dense<0.000000e+00> : vector<128xf32>
    %14 = vector.multi_reduction <add>, %8, %cst_11 [0] : vector<128x128xf32> to vector<128xf32>
    %15 = vector.shape_cast %14 : vector<128xf32> to vector<1x128xf32>
    %16 = arith.mulf %8, %8 : vector<128x128xf32>
    %cst_12 = arith.constant dense<0.000000e+00> : vector<128xf32>
    %17 = vector.multi_reduction <add>, %16, %cst_12 [0] : vector<128x128xf32> to vector<128xf32>
    %18 = vector.shape_cast %17 : vector<128xf32> to vector<1x128xf32>
    %cst_13 = arith.constant 0.000000e+00 : f32
    %19 = vector.broadcast %cst_13 : f32 to vector<1x128xf32>
    %cst_14 = arith.constant 0.000000e+00 : f32
    %20 = vector.broadcast %cst_14 : f32 to vector<1x128xf32>
    %cst_15 = arith.constant 0.000000e+00 : f32
    %21 = vector.broadcast %cst_15 : f32 to vector<1x128xf32>
    %cst_16 = arith.constant 0.000000e+00 : f32
    %22 = vector.broadcast %cst_16 : f32 to vector<1x128xf32>
    %c0_17 = arith.constant 0 : index
    %c0_18 = arith.constant 0 : index
    %23 = vector.load %arg6[%c0_17, %c0_18] : memref<8x128xf32, #tpu.memory_space<vmem>>, vector<8x128xf32>
    %24 = tpu.concatenate %10, %13, %15, %18, %19, %20, %21, %22 in 0 : vector<1x128xf32>, vector<1x128xf32>, vector<1x128xf32>, vector<1x128xf32>, vector<1x128xf32>, vector<1x128xf32>, vector<1x128xf32>, vector<1x128xf32> -> vector<8x128xf32>
    %25 = arith.addf %23, %24 : vector<8x128xf32>
    %c0_19 = arith.constant 0 : index
    %c0_20 = arith.constant 0 : index
    %26 = vector.load %arg6[%c0_19, %c0_20] : memref<8x128xf32, #tpu.memory_space<vmem>>, vector<8x128xf32>
    tpu.vector_store %arg6[%c0_19, %c0_20], %25 {strides = array<i32>} : memref<8x128xf32, #tpu.memory_space<vmem>>, vector<8x128xf32>,
    return
  }
  func.func @transform_0(%arg0: i32, %arg1: i32) -> (i32, i32) {
    %c0_i32 = arith.constant 0 : i32
    %c0_i32_0 = arith.constant 0 : i32
    return %arg1, %c0_i32 : i32, i32
  }
  func.func @transform_1(%arg0: i32, %arg1: i32) -> (i32, i32) {
    %c0_i32 = arith.constant 0 : i32
    %c0_i32_0 = arith.constant 0 : i32
    return %arg1, %c0_i32 : i32, i32
  }
  func.func @transform_2(%arg0: i32, %arg1: i32) -> (i32, i32) {
    %c0_i32 = arith.constant 0 : i32
    %c0_i32_0 = arith.constant 0 : i32
    return %c0_i32, %arg0 : i32, i32
  }
  func.func @transform_3(%arg0: i32, %arg1: i32) -> (i32, i32) {
    %c0_i32 = arith.constant 0 : i32
    %c0_i32_0 = arith.constant 0 : i32
    return %c0_i32, %arg0 : i32, i32
  }
  func.func @transform_4(%arg0: i32, %arg1: i32) -> (i32, i32) {
    %c0_i32 = arith.constant 0 : i32
    %c0_i32_0 = arith.constant 0 : i32
    return %c0_i32, %arg0 : i32, i32
  }
}

</mosaic_0001>

<bundles_post_ra>
// kernel: tpu_custom_call.1
= control target key start
LH: loop header
LB: loop body
LE: loop exit
PB: predicated region body
PF: predicated region fallthrough
CT: control target
= control target key end

     0   :  { %9 = vsyncpa [#allocation3], 0  ;;  %s924_s0 = inlined_call_operand.vmem [shape: bf16[128,40], index: 0, kind: input, shape index: {}]   ;;  %s925_s1 = inlined_call_operand.vmem [shape: bf16[128,128], index: 1, kind: input, shape index: {}]   ;;  %s926_s2 = inlined_call_operand.vmem [shape: bf16[40,128], index: 2, kind: input, shape index: {}]   ;;  %s927_s3 = inlined_call_operand.hbm [shape: bf16[128,128], index: 3, kind: input, shape index: {}]   ;;  %s928_s4 = inlined_call_operand.hbm [shape: f32[8,128], index: 4, kind: output, shape index: {}]  }
   0x1   :  { %10 = vsyncpa [#allocation4], 0  ;;  %s821_s15 = smov [#allocation2]  }
   0x2   :  { %s22_s16 = sshll.u32 %s821_s15, 4  ;;  %s23_s16 = int_to_ptr.vmem [resolvable:$true] %s22_s16 }
   0x3   :  { %s785_s17 = scalar_lea.vmem %s23_s16, 1024  ;;  %p790_p1 = scmp.lt.s32.totalorder %s23_s16, %s23_s16 }
   0x4   :  { %p786_p0 = scmp.ne.s32.totalorder %s23_s16, %s785_s17  ;;  %p791_p2 = scmp.lt.s32.totalorder %s785_s17, %s785_s17 }
   0x6   :  { %p792_p3 = por %p791_p2, %p790_p1 }
   0x8   :  { %p793_p4 = pnand %p792_p3, %p786_p0 }
   0xa   :  { %796 = shalt.err (!%p793_p4)
}
   0xb   :  { %s822_s18 = smov 64   ;;  %s823_s19 = smov 4  }
   0xc   :  { %28 = dma.hbm_to_vmem [thread:$0]  %s927_s3, 1024, %s23_s16, [#allocation3], %s822_s18, %s822_s18, %s823_s19  }
   0xd   :  { %817 = dma.done.wait [#allocation3], 1024  }
   0xe   :  { %818 = vsyncadd [#allocation3], 4294966272  ;;  %vm139_vm0 = vcmask 1043456   ;;  %v750_v0 = vld [vmem:[%s926_s2 + $0x10] ss:$0 sps:$4 sm:$0xff]   ;;  %v751_v1 = vld [vmem:[%s926_s2 + $0x8] sm:$0xff]  }
   0xf   :  { %744 = vmatprep.subr.msk.bf16.mxu0 %vm139_vm0, %v750_v0  ;;  %v141_v2 = vsel %vm139_vm0, %v750_v0, 0  ;;  %vm114_vm1 = vcmask 326656   ;;  %v753_v3 = vld [vmem:[%s924_s0] sm:$0xff]   ;;  %v755_v5 = vld [vmem:[#allocation2 + $0x38] sm:$0xff]   ;;  %v756_v6 = vld [vmem:[#allocation2 + $0x30] sm:$0xff]   ;;  %vm582_vm2 = vcmask 1040384  }
  0x10   :  { %675 = vmatpush3.bf16.msra.mxu0 %v141_v2  ;;  %v752_v4 = vld [vmem:[%s926_s2] sm:$0xff]   ;;  %680 = vmatprep.mubr.msk.bf16.mxu0 %vm114_vm1, %v753_v3  ;;  %v754_v7 = vld [vmem:[%s924_s0 + $0x8] sm:$0xff]   ;;  %v757_v8 = vld [vmem:[%s924_s0 + $0x10] sm:$0xff]   ;;  %vm584_vm3 = vcmask 1041408   ;;  %vm586_vm4 = vcmask 1042432   ;;  %vm589_vm5 = vcmask 1044480  }
  0x11   :  { %676 = vmatprep.subr.bf16.mxu0 %v751_v1  ;;  %728 = vmatprep.subr.bf16.mxu1 %v755_v5  ;;  %v759_v9 = vld [vmem:[#allocation2 + $0x28] sm:$0xff]   ;;  %v760_v10 = vld [vmem:[#allocation2 + $0x20] sm:$0xff]   ;;  %v758_v11 = vld [vmem:[%s924_s0 + $0x18] sm:$0xff]   ;;  %vm591_vm6 = vcmask 1045504   ;;  %vm593_vm7 = vcmask 1046528  }
  0x12   :  { %736 = vmatpush3.bf16.msra.mxu1 %v755_v5  ;;  %v761_v12 = vld [vmem:[%s924_s0 + $0x20] sm:$0xff]   ;;  %v763_v13 = vld [vmem:[#allocation2 + $0x18] sm:$0xff]   ;;  %v771_v14 = vld [vmem:[%s925_s1 + $0x10] sm:$0xff]  }
  0x13   :  { %729 = vmatprep.subr.bf16.mxu1 %v756_v6  ;;  %v764_v15 = vld [vmem:[#allocation2 + $0x10] sm:$0xff]   ;;  %716 = vmatprep.mubr.bf16.mxu1 %v771_v14  ;;  %v762_v16 = vld [vmem:[%s924_s0 + $0x28] sm:$0xff]   ;;  %v768_v19 = vld [vmem:[#allocation2] sm:$0xff]  }
  0x14   :  { %677 = vmatpush3.bf16.msra.mxu0 %v751_v1  ;;  %v765_v17 = vld [vmem:[%s924_s0 + $0x30] sm:$0xff]   ;;  %v767_v18 = vld [vmem:[#allocation2 + $0x8] sm:$0xff]   ;;  %v766_v20 = vld [vmem:[%s924_s0 + $0x38] sm:$0xff]  }
  0x15   :  { %678 = vmatprep.subr.bf16.mxu0 %v752_v4  ;;  %v769_v21 = vld [vmem:[%s925_s1] sm:$0xff]   ;;  %v772_v22 = vld [vmem:[%s925_s1 + $0x18] sm:$0xff]   ;;  %v770_v24 = vld [vmem:[%s925_s1 + $0x8] sm:$0xff]  }
  0x16   :  { %737 = vmatpush3.bf16.msra.mxu1 %v756_v6  ;;  %v773_v23 = vld [vmem:[%s925_s1 + $0x20] sm:$0xff]   ;;  %v774_v25 = vld [vmem:[%s925_s1 + $0x28] sm:$0xff]   ;;  %v775_v26 = vld [vmem:[%s925_s1 + $0x30] sm:$0xff]  }
  0x17   :  { %730 = vmatprep.subr.bf16.mxu1 %v759_v9  ;;  %v776_v27 = vld [vmem:[%s925_s1 + $0x38] sm:$0xff]   ;;  %s824_s1 = smov [#allocation5]  }
  0x18   :  { %679 = vmatpush3.bf16.msra.mxu0 %v752_v4  ;;  %s603_s30 = sshll.u32 %s824_s1, 4  ;;  %s604_s30 = int_to_ptr.vmem [resolvable:$true] %s603_s30 }
  0x19   :  { %696 = vmatprep.subr.bf16.mxu0 %v755_v5  ;;  %s797_s5 = scalar_lea.vmem %s604_s30, 128  ;;  %p802_p6 = scmp.lt.s32.totalorder %s604_s30, %s604_s30 }
  0x1a   :  { %738 = vmatpush3.bf16.msra.mxu1 %v759_v9  ;;  %p798_p5 = scmp.ne.s32.totalorder %s604_s30, %s797_s5  ;;  %p803_p7 = scmp.lt.s32.totalorder %s797_s5, %s797_s5 }
  0x1b   :  { %681 = vmatmul.mubr.msk.bf16.vlgmr.msra.gmra.mxu0 %vm114_vm1, %v754_v7  ;;  %731 = vmatprep.subr.bf16.mxu1 %v760_v10 }
  0x1c   :  { %697 = vmatpush3.bf16.msra.mxu0 %v755_v5  ;;  %684 = vmatprep.mubr.msk.bf16.mxu0 %vm114_vm1, %v757_v8  ;;  %p804_p8 = por %p803_p7, %p802_p6 }
  0x1d   :  { %698 = vmatprep.subr.bf16.mxu0 %v756_v6 }
  0x1e   :  { %739 = vmatpush3.bf16.msra.mxu1 %v760_v10  ;;  %p805_p9 = pnand %p804_p8, %p798_p5 }
  0x1f   :  { %732 = vmatprep.subr.bf16.mxu1 %v763_v13 }
  0x20   :  { %699 = vmatpush3.bf16.msra.mxu0 %v756_v6 }
  0x21   :  { %700 = vmatprep.subr.bf16.mxu0 %v759_v9 }
  0x22   :  { %740 = vmatpush3.bf16.msra.mxu1 %v763_v13 }
  0x23   :  { %685 = vmatmul.mubr.msk.bf16.gmra.mxu0 %vm114_vm1, %v758_v11  ;;  %733 = vmatprep.subr.bf16.mxu1 %v764_v15 }
  0x24   :  { %701 = vmatpush3.bf16.msra.mxu0 %v759_v9  ;;  %688 = vmatprep.mubr.msk.bf16.mxu0 %vm114_vm1, %v761_v12 }
  0x25   :  { %702 = vmatprep.subr.bf16.mxu0 %v760_v10 }
  0x26   :  { %741 = vmatpush3.bf16.msra.mxu1 %v764_v15 }
  0x27   :  { %734 = vmatprep.subr.bf16.mxu1 %v767_v18 }
  0x28   :  { %703 = vmatpush3.bf16.msra.mxu0 %v760_v10 }
  0x29   :  { %704 = vmatprep.subr.bf16.mxu0 %v763_v13 }
  0x2a   :  { %742 = vmatpush3.bf16.msra.mxu1 %v767_v18 }
  0x2b   :  { %689 = vmatmul.mubr.msk.bf16.gmra.mxu0 %vm114_vm1, %v762_v16  ;;  %735 = vmatprep.subr.bf16.mxu1 %v768_v19 }
  0x2c   :  { %705 = vmatpush3.bf16.msra.mxu0 %v763_v13  ;;  %692 = vmatprep.mubr.msk.bf16.mxu0 %vm114_vm1, %v765_v17 }
  0x2d   :  { %706 = vmatprep.subr.bf16.mxu0 %v764_v15 }
  0x2e   :  { %743 = vmatpush3.bf16.msra.mxu1 %v768_v19 }
  0x30   :  { %707 = vmatpush3.bf16.msra.mxu0 %v764_v15 }
  0x31   :  { %708 = vmatprep.subr.bf16.mxu0 %v767_v18  ;;  %717 = vmatmul.mubr.bf16.vlgmr.msra.gmra.mxu1 %v772_v22 }
  0x32   :  { %720 = vmatprep.mubr.bf16.mxu1 %v773_v23 }
  0x33   :  { %693 = vmatmul.mubr.msk.bf16.gmra.mxu0 %vm114_vm1, %v766_v20 }
  0x34   :  { %709 = vmatpush3.bf16.msra.mxu0 %v767_v18  ;;  %712 = vmatprep.mubr.bf16.mxu0 %v769_v21 }
  0x35   :  { %710 = vmatprep.subr.bf16.mxu0 %v768_v19 }
  0x38   :  { %711 = vmatpush3.bf16.msra.mxu0 %v768_v19 }
  0x39   :  { %721 = vmatmul.mubr.bf16.gmra.mxu1 %v774_v25 }
  0x3a   :  { %724 = vmatprep.mubr.bf16.mxu1 %v775_v26 }
  0x3b   :  { %713 = vmatmul.mubr.bf16.vlgmr.msra.gmra.mxu0 %v770_v24 }
  0x41   :  { %725 = vmatmul.mubr.bf16.gmra.mxu1 %v776_v27 }
  0xdb   :  { %v682_v28 = vpop.f32.mrf.mxu0 }
  0xdc   :  { %v488_v36 = vmul.f32 %v682_v28, %v682_v28 }
  0xdd   :  { %v177_v29 = vpop.f32.mrf.mxu0 }
  0xde   :  { %v486_v32 = vmul.f32 %v177_v29, %v177_v29 }
  0xdf   :  { %v683_v30 = vpop.f32.mrf.mxu0 }
  0xe0   :  { %v489_v40 = vmul.f32 %v683_v30, %v683_v30 }
  0xe1   :  { %v180_v31 = vpop.f32.mrf.mxu0 }
  0xe2   :  { %v465_v33 = vadd.f32 %v180_v31, %v177_v29  ;;  %v487_v34 = vmul.f32 %v180_v31, %v180_v31 }
  0xe3   :  { %v686_v35 = vpop.f32.mrf.mxu0 }
  0xe4   :  { %v466_v37 = vadd.f32 %v682_v28, %v465_v33  ;;  %v502_v38 = vadd.f32 %v487_v34, %v486_v32  ;;  %v492_v52 = vmul.f32 %v686_v35, %v686_v35 }
  0xe5   :  { %v193_v39 = vpop.f32.mrf.mxu0 }
  0xe6   :  { %v503_v41 = vadd.f32 %v502_v38, %v488_v36  ;;  %v467_v42 = vadd.f32 %v683_v30, %v466_v37  ;;  %v490_v45 = vmul.f32 %v193_v39, %v193_v39 }
  0xe7   :  { %v687_v43 = vpop.f32.mrf.mxu0 }
  0xe8   :  { %v468_v44 = vadd.f32 %v467_v42, %v193_v39  ;;  %v504_v46 = vadd.f32 %v503_v41, %v489_v40  ;;  %v493_v56 = vmul.f32 %v687_v43, %v687_v43 }
  0xe9   :  { %v196_v47 = vpop.f32.mrf.mxu0 }
  0xea   :  { %v505_v48 = vadd.f32 %v504_v46, %v490_v45  ;;  %v469_v49 = vadd.f32 %v468_v44, %v196_v47  ;;  %v491_v50 = vmul.f32 %v196_v47, %v196_v47 }
  0xeb   :  { %v690_v51 = vpop.f32.mrf.mxu0 }
  0xec   :  { %v506_v53 = vadd.f32 %v505_v48, %v491_v50  ;;  %v470_v54 = vadd.f32 %v686_v35, %v469_v49  ;;  %v496_v8 = vmul.f32 %v690_v51, %v690_v51 }
  0xed   :  { %v209_v55 = vpop.f32.mrf.mxu0 }
  0xee   :  { %v507_v57 = vadd.f32 %v506_v53, %v492_v52  ;;  %v471_v60 = vadd.f32 %v687_v43, %v470_v54  ;;  %v494_v61 = vmul.f32 %v209_v55, %v209_v55 }
  0xef   :  { %v691_v58 = vpop.f32.mrf.mxu0 }
  0xf0   :  { %v508_v59 = vadd.f32 %v507_v57, %v493_v56  ;;  %v472_v2 = vadd.f32 %v471_v60, %v209_v55  ;;  %v497_v15 = vmul.f32 %v691_v58, %v691_v58 }
  0xf1   :  { %v212_v62 = vpop.f32.mrf.mxu0  ;;  %v718_v4 = vpop.f32.mrf.mxu1 }
  0xf2   :  { %v509_v63 = vadd.f32 %v508_v59, %v494_v61  ;;  %v495_v0 = vmul.f32 %v212_v62, %v212_v62  ;;  %v473_v9 = vadd.f32 %v472_v2, %v212_v62  ;;  %v550_v50 = vmul.f32 %v718_v4, %v718_v4 }
  0xf3   :  { %v694_v1 = vpop.f32.mrf.mxu0  ;;  %v418_v7 = vpop.f32.mrf.mxu1 }
  0xf4   :  { %v510_v5 = vadd.f32 %v509_v63, %v495_v0  ;;  %v474_v16 = vadd.f32 %v690_v51, %v473_v9  ;;  %v548_v40 = vmul.f32 %v418_v7, %v418_v7  ;;  %v500_v43 = vmul.f32 %v694_v1, %v694_v1 }
  0xf5   :  { %v225_v3 = vpop.f32.mrf.mxu0  ;;  %v719_v11 = vpop.f32.mrf.mxu1 }
  0xf6   :  { %v511_v12 = vadd.f32 %v510_v5, %v496_v8  ;;  %v475_v22 = vadd.f32 %v691_v58, %v474_v16  ;;  %v498_v23 = vmul.f32 %v225_v3, %v225_v3  ;;  %v551_v55 = vmul.f32 %v719_v11, %v719_v11 }
  0xf7   :  { %v695_v6 = vpop.f32.mrf.mxu0  ;;  %v421_v14 = vpop.f32.mrf.mxu1 }
  0xf8   :  { %v512_v19 = vadd.f32 %v511_v12, %v497_v15  ;;  %v476_v34 = vadd.f32 %v475_v22, %v225_v3  ;;  %v549_v46 = vmul.f32 %v421_v14, %v421_v14  ;;  %v501_v53 = vmul.f32 %v695_v6, %v695_v6 }
  0xf9   :  { %v228_v10 = vpop.f32.mrf.mxu0  ;;  %v722_v18 = vpop.f32.mrf.mxu1 }
  0xfa   :  { %v513_v28 = vadd.f32 %v512_v19, %v498_v23  ;;  %v499_v29 = vmul.f32 %v228_v10, %v228_v10  ;;  %v477_v44 = vadd.f32 %v476_v34, %v228_v10  ;;  %v554_v8 = vmul.f32 %v722_v18, %v722_v18 }
  0xfb   :  { %v714_v13 = vpop.f32.mrf.mxu0  ;;  %v434_v21 = vpop.f32.mrf.mxu1 }
  0xfc   :  { %v546_v31 = vmul.f32 %v714_v13, %v714_v13  ;;  %v514_v38 = vadd.f32 %v513_v28, %v499_v29  ;;  %v478_v54 = vadd.f32 %v694_v1, %v477_v44  ;;  %v552_v61 = vmul.f32 %v434_v21, %v434_v21 }
  0xfd   :  { %v402_v17 = vpop.f32.mrf.mxu0  ;;  %v723_v30 = vpop.f32.mrf.mxu1 }
  0xfe   :  { %v544_v25 = vmul.f32 %v402_v17, %v402_v17  ;;  %v515_v48 = vadd.f32 %v514_v38, %v500_v43  ;;  %v479_v63 = vadd.f32 %v695_v6, %v478_v54  ;;  %v555_v12 = vmul.f32 %v723_v30, %v723_v30 }
  0xff   :  { %v715_v20 = vpop.f32.mrf.mxu0  ;;  %v437_v39 = vpop.f32.mrf.mxu1 }
 0x100   :  { %v547_v35 = vmul.f32 %v715_v20, %v715_v20  ;;  %v516_v58 = vadd.f32 %v515_v48, %v501_v53  ;;  %v553_v3 = vmul.f32 %v437_v39, %v437_v39  ;;  %v480_v10 = vrot.slane %v479_v63, 4 }
 0x101   :  { %v405_v24 = vpop.f32.mrf.mxu0  ;;  %v726_v49 = vpop.f32.mrf.mxu1 }
 0x102   :  { %v523_v26 = vadd.f32 %v405_v24, %v402_v17  ;;  %v545_v27 = vmul.f32 %v405_v24, %v405_v24  ;;  %v517_v5 = vrot.slane %v516_v58, 4  ;;  %v481_v19 = vadd.f32 %v480_v10, %v479_v63 }
 0x103   :  { %v450_v59 = vpop.f32.mrf.mxu1  ;;  %v558_v23 = vmul.f32 %v726_v49, %v726_v49 }
 0x104   :  { %v524_v32 = vadd.f32 %v714_v13, %v523_v26  ;;  %v560_v33 = vadd.f32 %v545_v27, %v544_v25  ;;  %v556_v16 = vmul.f32 %v450_v59, %v450_v59  ;;  %v482_v26 = vrot.slane %v481_v19, 2 }
 0x106   :  { %v525_v36 = vadd.f32 %v715_v20, %v524_v32  ;;  %v561_v37 = vadd.f32 %v560_v33, %v546_v31  ;;  %v483_v32 = vadd.f32 %v482_v26, %v481_v19 }
 0x108   :  { %v562_v41 = vadd.f32 %v561_v37, %v547_v35  ;;  %v526_v42 = vadd.f32 %v525_v36, %v418_v7  ;;  %v727_v7 = vpop.f32.mrf.mxu1  ;;  %v484_v38 = vrot.slane %v483_v32, 1 }
 0x10a   :  { %v527_v45 = vadd.f32 %v526_v42, %v421_v14  ;;  %v563_v47 = vadd.f32 %v562_v41, %v548_v40  ;;  %v518_v14 = vadd.f32 %v517_v5, %v516_v58  ;;  %v485_v44 = vadd.f32 %v484_v38, %v483_v32 }
 0x10c   :  { %v528_v51 = vadd.f32 %v718_v4, %v527_v45  ;;  %v564_v52 = vadd.f32 %v563_v47, %v549_v46  ;;  %v519_v22 = vrot.slane %v518_v14, 2 }
 0x10e   :  { %v565_v56 = vadd.f32 %v564_v52, %v550_v50  ;;  %v529_v57 = vadd.f32 %v719_v11, %v528_v51  ;;  %v453_v11 = vpop.f32.mrf.mxu1  ;;  %v520_v29 = vadd.f32 %v519_v22, %v518_v14 }
 0x110   :  { %v530_v60 = vadd.f32 %v529_v57, %v434_v21  ;;  %v566_v62 = vadd.f32 %v565_v56, %v551_v55  ;;  %v557_v21 = vmul.f32 %v453_v11, %v453_v11  ;;  %v521_v35 = vrot.slane %v520_v29, 1 }
 0x112   :  { %v567_v0 = vadd.f32 %v566_v62, %v552_v61  ;;  %v531_v2 = vadd.f32 %v530_v60, %v437_v39  ;;  %v522_v41 = vadd.f32 %v521_v35, %v520_v29 }
 0x114   :  { %v532_v9 = vadd.f32 %v722_v18, %v531_v2  ;;  %v568_v4 = vadd.f32 %v567_v0, %v553_v3  ;;  %v559_v18 = vmul.f32 %v727_v7, %v727_v7  ;;  %v583_v47 = vsel %vm582_vm2, %v485_v44, %v522_v41 }
 0x116   :  { %v569_v1 = vadd.f32 %v568_v4, %v554_v8  ;;  %v533_v13 = vadd.f32 %v723_v30, %v532_v9 }
 0x118   :  { %v534_v15 = vadd.f32 %v533_v13, %v450_v59  ;;  %v570_v17 = vadd.f32 %v569_v1, %v555_v12 }
 0x11a   :  { %v571_v20 = vadd.f32 %v570_v17, %v556_v16  ;;  %v535_v6 = vadd.f32 %v534_v15, %v453_v11 }
 0x11c   :  { %v536_v24 = vadd.f32 %v726_v49, %v535_v6  ;;  %v572_v25 = vadd.f32 %v571_v20, %v557_v21 }
 0x11e   :  { %v537_v27 = vadd.f32 %v727_v7, %v536_v24  ;;  %v573_v28 = vadd.f32 %v572_v25, %v558_v23 }
 0x120   :  { %v538_v31 = vrot.slane %v537_v27, 4  ;;  %v574_v30 = vadd.f32 %v573_v28, %v559_v18 }
 0x122   :  { %v539_v33 = vadd.f32 %v538_v31, %v537_v27  ;;  %v575_v34 = vrot.slane %v574_v30, 4 }
 0x124   :  { %v540_v36 = vrot.slane %v539_v33, 2  ;;  %v576_v37 = vadd.f32 %v575_v34, %v574_v30 }
 0x126   :  { %v541_v39 = vadd.f32 %v540_v36, %v539_v33  ;;  %v577_v40 = vrot.slane %v576_v37, 2 }
 0x128   :  { %v542_v42 = vrot.slane %v541_v39, 1  ;;  %v578_v43 = vadd.f32 %v577_v40, %v576_v37 }
 0x12a   :  { %v543_v45 = vadd.f32 %v542_v42, %v541_v39  ;;  %v579_v46 = vrot.slane %v578_v43, 1 }
 0x12c   :  { %v580_v48 = vadd.f32 %v579_v46, %v578_v43  ;;  %v585_v49 = vsel %vm584_vm3, %v583_v47, %v543_v45 }
 0x12e   :  { %v587_v50 = vsel %vm586_vm4, %v585_v49, %v580_v48 }
 0x12f   :  { %v588_v51 = vsel %vm139_vm0, %v587_v50, 0.0 }
 0x130   :  { %v590_v52 = vsel %vm589_vm5, %v588_v51, 0.0 }
 0x131   :  { %v592_v53 = vsel %vm591_vm6, %v590_v52, 0.0 }
 0x132   :  { %v594_v54 = vsel %vm593_vm7, %v592_v53, 0.0 }
 0x133   :  { %596 = vst [vmem:[#allocation5] sm:$0xff] %v594_v54 }
 0x134   :  { %808 = shalt.err (!%p805_p9)
}
 0x135   :  { %606 = dma.vmem_to_hbm [thread:$0]  %s604_s30, 128, %s928_s4, [#allocation4]  }
 0x136   :  { %819 = dma.done.wait [#allocation4], 128  }
 0x137   :  { %820 = vsyncadd [#allocation4], 4294967168 }
 0x138   :  { %610 = vsyncpa [#allocation3], 1 }
 0x139   :  { %611 = vsyncpa [#allocation4], 1 }

</bundles_post_ra>
